<compile_context>
chip_gen: v7x
topology: tpu7x:2x2x1
jax: 0.10.0
libtpu: 0.0.40
codegen_flags: <defaults>
</compile_context>

<pallas_src>
import jax
import jax.numpy as jnp
from jax.experimental import pallas as pl
from jax.experimental.pallas import tpu as pltpu

_LANES = 128          # lane width of one vreg row (last dim maps to lanes)
_DEFAULT_BLOCK_ROWS = 2048   # 2048 x 128 x 4B = 1 MiB per block (f32)


def _ubrelu_kernel(x_ref, o_ref):
    x = x_ref[...]
    zero = jnp.asarray(0, dtype=x.dtype)
    one = jnp.asarray(1, dtype=x.dtype)
    # bounded relu: min(relu(x), 1)  ==  clamp(x, 0, 1)
    o_ref[...] = jnp.minimum(jnp.maximum(x, zero), one)


def ubrelu(x, block_rows=_DEFAULT_BLOCK_ROWS):
    """Bounded ReLU min(relu(x), 1) for an arbitrarily shaped array."""
    orig_shape = x.shape
    dtype = x.dtype
    n = x.size

    # Flatten to a lane-dense (rows, 128) slab.
    rows = pl.cdiv(n, _LANES)
    rows8 = max(8, ((rows + 7) // 8) * 8)          # sublane-align row count
    blk = min(block_rows, rows8)                   # both are multiples of 8
    grid = pl.cdiv(rows8, blk)
    padded_rows = grid * blk
    pad = padded_rows * _LANES - n

    flat = x.reshape(-1)
    if pad:
        flat = jnp.pad(flat, (0, pad))
    x2d = flat.reshape(padded_rows, _LANES)

    out2d = pl.pallas_call(
        _ubrelu_kernel,
        out_shape=jax.ShapeDtypeStruct((padded_rows, _LANES), dtype),
        grid=(grid,),
        in_specs=[pl.BlockSpec((blk, _LANES), lambda i: (i, 0))],
        out_specs=pl.BlockSpec((blk, _LANES), lambda i: (i, 0)),
        compiler_params=pltpu.CompilerParams(
            dimension_semantics=("parallel",),       # v7x: split tiles across TCs
            vmem_limit_bytes=32 * 1024 * 1024,       # explicit, with headroom
        ),
    )(x2d)

    return out2d.reshape(-1)[:n].reshape(orig_shape)


def _reference(x):
    return jnp.clip(x, 0.0, 1.0)


if __name__ == "__main__":
    key = jax.random.PRNGKey(0)
    # Small shape consistent with an elementwise activation module.
    x = 2.0 * jax.random.normal(key, (2, 4, 16, 16), jnp.float32)

    out = ubrelu(x)
    out = jax.block_until_ready(out)

    ref = _reference(x)
    assert out.shape == x.shape
    assert out.dtype == x.dtype
    assert jnp.allclose(out, ref, atol=0.0, rtol=0.0)

    print("KERNEL_OK")
</pallas_src>

<mosaic_0001>
module attributes {stable_mosaic.version = 11 : i64} {
  func.func @_ubrelu_kernel(%arg0: i32, %arg1: memref<16x128xf32, #tpu.memory_space<vmem>>, %arg2: memref<16x128xf32, #tpu.memory_space<vmem>>) attributes {dimension_semantics = [#tpu.dimension_semantics<parallel>], iteration_bounds = array<i64: 1>, scalar_prefetch = 0 : i64, scratch_operands = 0 : i64, tpu.core_type = #tpu.core_type<tc>, window_params = [{transform_indices = @transform_0, window_bounds = array<i64: 16, 128>}, {transform_indices = @transform_1, window_bounds = array<i64: 16, 128>}]} {
    %c0 = arith.constant 0 : index
    %c0_0 = arith.constant 0 : index
    %0 = vector.load %arg1[%c0, %c0_0] : memref<16x128xf32, #tpu.memory_space<vmem>>, vector<16x128xf32>
    %cst = arith.constant 0.000000e+00 : f32
    %1 = vector.broadcast %cst : f32 to vector<16x128xf32>
    %2 = arith.maximumf %0, %1 : vector<16x128xf32>
    %cst_1 = arith.constant 1.000000e+00 : f32
    %3 = vector.broadcast %cst_1 : f32 to vector<16x128xf32>
    %4 = arith.minimumf %2, %3 : vector<16x128xf32>
    %c0_2 = arith.constant 0 : index
    %c0_3 = arith.constant 0 : index
    %5 = vector.load %arg2[%c0_2, %c0_3] : memref<16x128xf32, #tpu.memory_space<vmem>>, vector<16x128xf32>
    tpu.vector_store %arg2[%c0_2, %c0_3], %4 {strides = array<i32>} : memref<16x128xf32, #tpu.memory_space<vmem>>, vector<16x128xf32>,
    return
  }
  func.func @transform_0(%arg0: i32) -> (i32, i32) {
    %c0_i32 = arith.constant 0 : i32
    %c0_i32_0 = arith.constant 0 : i32
    return %arg0, %c0_i32 : i32, i32
  }
  func.func @transform_1(%arg0: i32) -> (i32, i32) {
    %c0_i32 = arith.constant 0 : i32
    %c0_i32_0 = arith.constant 0 : i32
    return %arg0, %c0_i32 : i32, i32
  }
}

</mosaic_0001>

<bundles_post_ra>
// kernel: tpu_custom_call.1
= control target key start
LH: loop header
LB: loop body
LE: loop exit
PB: predicated region body
PF: predicated region fallthrough
CT: control target
= control target key end

     0   :  { %6 = vsyncpa [#allocation3], 0  ;;  %s144_s0 = inlined_call_operand.hbm [shape: f32[16,128], index: 0, kind: input, shape index: {}]   ;;  %s145_s1 = inlined_call_operand.hbm [shape: f32[16,128], index: 1, kind: output, shape index: {}]  }
   0x1   :  { %7 = vsyncpa [#allocation4], 0  ;;  %s100_s6 = smov [#allocation2]   ;;  %s52_s10 = scalar_lea.hbm %s144_s0, 256 }
   0x2   :  { %s13_s7 = sshll.u32 %s100_s6, 4  ;;  %p53_p0 = scmp.ne.s32.totalorder %s144_s0, %s52_s10  ;;  %s14_s7 = int_to_ptr.vmem [resolvable:$true] %s13_s7 }
   0x3   :  { %p56_p1 = scmp.lt.u32.totalorder %s52_s10, %s144_s0 }
   0x5   :  { %p58_p2 = pnand %p56_p1, %p53_p0 }
   0x7   :  { %61 = shalt.err (!%p58_p2)
}
   0x8   :  { %s62_s15 = scalar_lea.vmem %s14_s7, 256  ;;  %p67_p4 = scmp.lt.s32.totalorder %s14_s7, %s14_s7 }
   0x9   :  { %p63_p3 = scmp.ne.s32.totalorder %s14_s7, %s62_s15  ;;  %p68_p5 = scmp.lt.s32.totalorder %s62_s15, %s62_s15 }
   0xb   :  { %p69_p6 = por %p68_p5, %p67_p4 }
   0xd   :  { %p70_p7 = pnand %p69_p6, %p63_p3 }
   0xf   :  { %73 = shalt.err (!%p70_p7)
}
  0x10   :  { %s101_s16 = smov 128   ;;  %s102_s17 = smov 8  }
  0x11   :  { %19 = dma.hbm_to_vmem [thread:$0]  %s144_s0, 256, %s14_s7, [#allocation3], %s101_s16, %s101_s16, %s102_s17  }
  0x12   :  { %96 = dma.done.wait [#allocation3], 256  }
  0x13   :  { %97 = vsyncadd [#allocation3], 4294967040  ;;  %v23_v0 = vld [vmem:[#allocation2] sm:$0xff]  ;;  %v24_v1 = vld [vmem:[#allocation2 + $0x8] sm:$0xff]  ;;  %s103_s20 = smov [#allocation5]  }
  0x14   :  { %s36_s21 = sshll.u32 %s103_s20, 4  ;;  %v25_v2 = vmax.f32 %v23_v0, 0.0  ;;  %v26_v3 = vmax.f32 %v24_v1, 0.0  ;;  %s37_s21 = int_to_ptr.vmem [resolvable:$true] %s36_s21 }
  0x15   :  { %s74_s22 = scalar_lea.vmem %s37_s21, 256  ;;  %p79_p9 = scmp.lt.s32.totalorder %s37_s21, %s37_s21 }
  0x16   :  { %v27_v4 = vmin.f32 %v25_v2, 1.0  ;;  %v28_v5 = vmin.f32 %v26_v3, 1.0  ;;  %p75_p8 = scmp.ne.s32.totalorder %s37_s21, %s74_s22  ;;  %p80_p10 = scmp.lt.s32.totalorder %s74_s22, %s74_s22 }
  0x18   :  { %29 = vst [vmem:[#allocation5] sm:$0xff] %v27_v4  ;;  %30 = vst [vmem:[#allocation5 + $0x8] sm:$0xff] %v28_v5  ;;  %p81_p11 = por %p80_p10, %p79_p9 }
  0x1a   :  { %p82_p12 = pnand %p81_p11, %p75_p8 }
  0x1c   :  { %85 = shalt.err (!%p82_p12)
}
  0x1d   :  { %s86_s24 = scalar_lea.hbm %s145_s1, 256 }
  0x1e   :  { %p87_p13 = scmp.ne.s32.totalorder %s145_s1, %s86_s24  ;;  %p90_p0 = scmp.lt.u32.totalorder %s86_s24, %s145_s1 }
  0x20   :  { %p92_p1 = pnand %p90_p0, %p87_p13 }
  0x22   :  { %95 = shalt.err (!%p92_p1)
}
  0x23   :  { %42 = dma.vmem_to_hbm [thread:$0]  %s37_s21, 256, %s145_s1, [#allocation4], %s101_s16, %s101_s16, %s102_s17  }
  0x24   :  { %98 = dma.done.wait [#allocation4], 256  }
  0x25   :  { %99 = vsyncadd [#allocation4], 4294967040 }
  0x26   :  { %46 = vsyncpa [#allocation3], 1 }
  0x27   :  { %47 = vsyncpa [#allocation4], 1 }

</bundles_post_ra>
